<compile_context>
chip_gen: v7x
topology: tpu7x:2x2x1
jax: 0.10.0
libtpu: 0.0.40
codegen_flags: <defaults>
</compile_context>

<pallas_src>
import functools

import jax
import jax.numpy as jnp
from jax import lax
from jax.experimental import pallas as pl
from jax.experimental.pallas import tpu as pltpu


# --------------------------------------------------------------------------
# Generation-dependent knobs
# --------------------------------------------------------------------------

def _vmem_capacity_bytes():
    try:
        cap = getattr(pltpu.get_tpu_info(), "vmem_capacity_bytes", None)
        if cap:
            return int(cap)
    except Exception:
        pass
    return 64 * 1024 * 1024  # conservative: v7x per-TensorCore VMEM


_VMEM_CAP = _vmem_capacity_bytes()
_BIG_VMEM = _VMEM_CAP >= 100 * 1024 * 1024          # v5e/v6e (128 MiB)
_VMEM_LIMIT_BYTES = (96 if _BIG_VMEM else 48) * 1024 * 1024
_BAND_BLOCK_BYTES = (6 if _BIG_VMEM else 2) * 1024 * 1024

# f32-accurate MXU path.  On v6e/v7x this can be dropped to DEFAULT / bf16
# inputs (3x fewer MXU passes) if the accuracy budget allows; with the 1e-4
# test tolerance against an f32 reference we keep HIGHEST.
_CONV_PRECISION = lax.Precision.HIGHEST

_CONV_ROW_TILE = 512  # multiple of 8 and 128; M/N of the per-tile matmul


def _compiler_params(semantics):
    return pltpu.CompilerParams(
        dimension_semantics=semantics,
        vmem_limit_bytes=_VMEM_LIMIT_BYTES,
    )


def _round_up(a, b):
    return ((a + b - 1) // b) * b


# --------------------------------------------------------------------------
# DWT / IWT (Haar) butterfly kernels
# --------------------------------------------------------------------------

def _band_layout(n4, m, w2, itemsize):
    """Factor the flattened per-band axis (n4 = m * w2 elements) into
    (rows R, lanes L) with L a multiple of 128 when possible (lane-dense
    stores), and pick a row tile tR: multiple of 8, ~_BAND_BLOCK_BYTES per
    (4, tR, L) block, and >=2 grid steps when there is enough work."""
    L = None
    for cand in (4096, 2048, 1024, 512, 256, 128):
        if n4 % cand == 0:
            L = cand
            break
    if L is None:
        # Rare fallback (n4 not a multiple of 128): natural (rows, w2) layout.
        # Correct but lane-masked -> slow; acceptable for odd shapes.
        R, L = m, w2
    else:
        R = n4 // L

    target = max(8, _BAND_BLOCK_BYTES // (4 * L * itemsize))
    tR = min(R, target)
    if R >= 16:
        tR = min(tR, max(8, (R + 1) // 2))  # at least 2 grid steps
    if tR < R:
        tR = max(8, (tR // 8) * 8)          # sublane-aligned row tile
    return R, L, tR


def _dwt_kernel(x_ref, o_ref):
    # x_ref rows (parity slabs): 0 = even-row/even-col (x1),
    # 1 = even-row/odd-col (x3), 2 = odd-row/even-col (x2), 3 = odd/odd (x4).
    x1 = x_ref[0]
    x3 = x_ref[1]
    x2 = x_ref[2]
    x4 = x_ref[3]
    s_e = x1 + x2            # even-column sum
    s_o = x3 + x4            # odd-column sum
    d_e = x2 - x1
    d_o = x4 - x3
    o_ref[0] = (s_e + s_o) * 0.5    # LL =  x1 + x2 + x3 + x4   (/2 folded)
    o_ref[1] = (s_o - s_e) * 0.5    # HL = -x1 - x2 + x3 + x4
    o_ref[2] = (d_e + d_o) * 0.5    # LH = -x1 + x2 - x3 + x4
    o_ref[3] = (d_o - d_e) * 0.5    # HH =  x1 - x2 - x3 + x4


def _dwt_bands(x):
    """Returns the four Haar bands stacked as (4, b, c, h//2, w//2) in
    (LL, HL, LH, HH) order."""
    b, c, h, w = x.shape
    assert h % 2 == 0 and w % 2 == 0, "spatial dims must be even"
    h2, w2 = h // 2, w // 2
    m = b * c * h2
    n4 = m * w2

    # Single de-interleaving transpose (one XLA copy over the small,
    # num_channels-wide input) -> band-major slabs.
    slabs = jnp.transpose(x.reshape(m, 2, w2, 2), (1, 3, 0, 2)).reshape(4, n4)

    R, L, tR = _band_layout(n4, m, w2, x.dtype.itemsize)
    slabs = slabs.reshape(4, R, L)  # free reshape

    spec = pl.BlockSpec((4, tR, L), lambda i: (0, i, 0))
    out = pl.pallas_call(
        _dwt_kernel,
        out_shape=jax.ShapeDtypeStruct((4, R, L), x.dtype),
        grid=(pl.cdiv(R, tR),),
        in_specs=[spec],
        out_specs=spec,
        compiler_params=_compiler_params(("parallel",)),
    )(slabs)
    return out.reshape(4, b, c, h2, w2)


def dwt_pallas(x, expand=False):
    """Pallas implementation of dwt_init(x, expand)."""
    bands = _dwt_bands(x)
    b, c, h2, w2 = bands.shape[1:]
    if expand:
        top = jnp.concatenate((bands[0], bands[2]), axis=-1)  # LL | LH
        bot = jnp.concatenate((bands[1], bands[3]), axis=-1)  # HL | HH
        return jnp.concatenate((top, bot), axis=-2)
    # torch.cat((LL, HL, LH, HH), 0) == a free reshape of the band-major output
    return bands.reshape(4 * b, c, h2, w2)


def _iwt_kernel(x_ref, o_ref, *, scale):
    # x_ref rows: the four sub-bands x1..x4 (batch quarters / quadrants).
    x1 = x_ref[0]
    x2 = x_ref[1]
    x3 = x_ref[2]
    x4 = x_ref[3]
    s = x1 + x4
    q = x2 + x3
    u = x1 - x4
    v = x3 - x2
    # Output rows are parity slabs indexed (row_parity * 2 + col_parity).
    o_ref[0] = (s - q) * scale    # even row, even col: x1 - x2 - x3 + x4
    o_ref[1] = (u - v) * scale    # even row, odd  col: x1 + x2 - x3 - x4
    o_ref[2] = (u + v) * scale    # odd  row, even col: x1 - x2 + x3 - x4
    o_ref[3] = (s + q) * scale    # odd  row, odd  col: x1 + x2 + x3 + x4


def _iwt_core(bands_flat, scale, ob, oc, H, W, dtype):
    """bands_flat: (4, ob*oc*H*W) rows x1..x4 flattened in (ob, oc, H, W)
    order.  Returns the (ob, oc, 2H, 2W) interleaved reconstruction."""
    m = ob * oc * H
    n4 = m * W
    R, L, tR = _band_layout(n4, m, W, dtype.itemsize)
    bands_flat = bands_flat.reshape(4, R, L)

    spec = pl.BlockSpec((4, tR, L), lambda i: (0, i, 0))
    out = pl.pallas_call(
        functools.partial(_iwt_kernel, scale=scale),
        out_shape=jax.ShapeDtypeStruct((4, R, L), dtype),
        grid=(pl.cdiv(R, tR),),
        in_specs=[spec],
        out_specs=spec,
        compiler_params=_compiler_params(("parallel",)),
    )(bands_flat)

    # (row parity, col parity, row, col) -> interleave back (one XLA copy,
    # output tensor is only out_channels wide -> cheap).
    out = out.reshape(2, 2, m, W)
    out = jnp.transpose(out, (2, 0, 3, 1)).reshape(ob, oc, 2 * H, 2 * W)
    return out


def iwt_pallas(x, expand=False):
    """Pallas implementation of iwt_init(x, expand)."""
    ib, ic, ih, iw = x.shape
    if expand:
        H, W = ih // 2, iw // 2
        n4 = ib * ic * H * W
        bands = jnp.stack(
            (x[:, :, :H, :W].reshape(n4), x[:, :, H:, :W].reshape(n4),
             x[:, :, :H, W:].reshape(n4), x[:, :, H:, W:].reshape(n4)),
            axis=0)
        return _iwt_core(bands, 1.0, ib, ic, H, W, x.dtype)

    assert ib % 4 == 0
    ob, oc, H, W = ib // 4, ic, ih, iw
    bands = x.reshape(4, ob * oc * H * W)  # batch quarters are contiguous
    return _iwt_core(bands, 0.5, ob, oc, H, W, x.dtype)


# --------------------------------------------------------------------------
# 3x3 conv (stride 1, pad 1) + bias + ReLU, channel-major windowed kernel
# --------------------------------------------------------------------------
#
# Layout "CM-FPA" (channel-major flat padded activation): (C, n_tot) where the
# column index p enumerates (batch, padded_row, padded_col) of the spatially
# zero-padded NHWC image, with a `lead` column margin (multiple of the row
# tile) in front and a `tail` margin behind so every per-step window DMA is
# in-bounds.  Both convs consume and produce this layout, so the 64-channel
# activation never takes a wrapper relayout pass through HBM.

def _conv_geometry(bsz, h, w, t):
    hp, wp = h + 2, w + 2
    nb = bsz * hp * wp
    lead = _round_up(wp + 1, t)            # left margin (block-aligned)
    n_core = _round_up(nb, t)              # columns covered by the grid
    win = _round_up(t + 2 * wp + 2, 8)     # per-step window incl. halo
    tail = _round_up(win - t, t)           # right margin
    n_tot = lead + n_core + tail
    return hp, wp, nb, lead, n_core, win, n_tot


def _nchw_to_cm_fpa(x):
    bsz, cin, h, w = x.shape
    hp, wp, nb, lead, _, _, n_tot = _conv_geometry(bsz, h, w, _CONV_ROW_TILE)
    xp = jnp.pad(x, ((0, 0), (0, 0), (1, 1), (1, 1)))
    xcm = jnp.transpose(xp, (1, 0, 2, 3)).reshape(cin, nb)
    return jnp.pad(xcm, ((0, 0), (lead, n_tot - lead - nb)))


def _cm_fpa_to_nchw(xcm, bsz, h, w):
    c = xcm.shape[0]
    hp, wp, nb, lead, _, _, _ = _conv_geometry(bsz, h, w, _CONV_ROW_TILE)
    y = xcm[:, lead:lead + nb].reshape(c, bsz, hp, wp)[:, :, 1:h + 1, 1:w + 1]
    return jnp.transpose(y, (1, 0, 2, 3))


def _conv3x3_relu_kernel(x_hbm, w_ref, b_ref, o_ref, win_buf, sem, *,
                         t, wp, hp, nb, win, lead, h, w_img):
    i = pl.program_id(0)
    nsteps = pl.num_programs(0)
    slot = i % 2

    def window_copy(step, slot_idx):
        start = lead - wp - 1 + step * t
        return pltpu.make_async_copy(
            x_hbm.at[:, pl.ds(start, win)],
            win_buf.at[slot_idx],
            sem.at[slot_idx],
        )

    # Prime the pipeline on the first step, prefetch the next window while the
    # current tile computes (manual double buffer; grid axis is "arbitrary").
    @pl.when(i == 0)
    def _():
        window_copy(0, 0).start()

    @pl.when(i + 1 < nsteps)
    def _():
        window_copy(i + 1, 1 - slot).start()

    window_copy(i, slot).wait()

    # im2col: fold all 9 taps into the contraction dim -> one MXU matmul of
    # (Cout, 9*Cin) x (9*Cin, t) per tile, with a lane-dense (Cout, t) result.
    taps = [win_buf[slot, :, pl.ds(dy * wp + dx, t)]
            for dy in range(3) for dx in range(3)]
    lhs = jnp.concatenate(taps, axis=0)                       # (9*Cin, t)
    acc = jnp.dot(w_ref[...], lhs,
                  preferred_element_type=jnp.float32,
                  precision=_CONV_PRECISION)                  # (Cout, t)
    acc = jnp.maximum(acc + b_ref[...], 0.0)

    # Zero the columns that sit on zero-padding positions (or past the last
    # image), so the output can be chained straight into the next conv without
    # a wrapper re-pad pass.
    p = i * t + lax.broadcasted_iota(jnp.int32, (1, t), 1)
    yy = (p // wp) % hp
    xx = p % wp
    valid = (p < nb) & (yy >= 1) & (yy <= h) & (xx >= 1) & (xx <= w_img)
    o_ref[...] = jnp.where(valid, acc, 0.0).astype(o_ref.dtype)


def _conv3x3_relu_cm(xcm, weight, bias, bsz, h, w):
    """xcm: (Cin, n_tot) CM-FPA activation.  Returns (Cout, n_tot) CM-FPA."""
    cout, cin = weight.shape[0], weight.shape[1]
    t = _CONV_ROW_TILE
    hp, wp, nb, lead, n_core, win, n_tot = _conv_geometry(bsz, h, w, t)
    assert xcm.shape == (cin, n_tot), (xcm.shape, (cin, n_tot))

    # (Cout, Cin, 3, 3) -> (Cout, 9*Cin) with k = (dy*3+dx)*Cin + ci, matching
    # the tap-major / channel-minor im2col row order built in-kernel.
    w_cm = jnp.transpose(weight, (0, 2, 3, 1)).reshape(cout, 9 * cin)
    b_cm = bias.reshape(cout, 1)

    kernel = functools.partial(
        _conv3x3_relu_kernel,
        t=t, wp=wp, hp=hp, nb=nb, win=win, lead=lead, h=h, w_img=w)

    return pl.pallas_call(
        kernel,
        out_shape=jax.ShapeDtypeStruct((cout, n_tot), xcm.dtype),
        grid=(n_core // t,),
        in_specs=[
            pl.BlockSpec(memory_space=pl.ANY),             # activation in HBM
            pl.BlockSpec(w_cm.shape, lambda i: (0, 0)),    # weights resident
            pl.BlockSpec(b_cm.shape, lambda i: (0, 0)),
        ],
        out_specs=pl.BlockSpec((cout, t), lambda i, lb=lead // t: (0, lb + i)),
        scratch_shapes=[
            pltpu.VMEM((2, cin, win), xcm.dtype),          # double-buffered window
            pltpu.SemaphoreType.DMA((2,)),
        ],
        compiler_params=pltpu.CompilerParams(
            # The manual double buffer carries state across grid steps, so the
            # row-tile axis must stay sequential.
            dimension_semantics=("arbitrary",),
            vmem_limit_bytes=_VMEM_LIMIT_BYTES,
        ),
    )(xcm, w_cm, b_cm)


def conv3x3_relu_pallas(x, weight, bias):
    """Standalone 3x3, stride-1, pad-1 conv + bias + ReLU (NCHW in/out)."""
    bsz, _, h, w = x.shape
    xcm = _nchw_to_cm_fpa(x)
    out = _conv3x3_relu_cm(xcm, weight, bias, bsz, h, w)
    return _cm_fpa_to_nchw(out, bsz, h, w)


# --------------------------------------------------------------------------
# SRCNN forward
# --------------------------------------------------------------------------

def srcnn_forward_pallas(x, w1, b1, w2, b2, expand=False):
    y = dwt_pallas(x, expand=expand)
    bsz, _, hh, ww = y.shape
    # One cheap (num_channels-wide) conversion into the channel-major padded
    # layout; the two convs then chain in that layout with zero HBM relayout
    # passes over the 64-channel intermediate activation.
    a0 = _nchw_to_cm_fpa(y)
    a1 = _conv3x3_relu_cm(a0, w1, b1, bsz, hh, ww)
    a2 = _conv3x3_relu_cm(a1, w2, b2, bsz, hh, ww)
    z = _cm_fpa_to_nchw(a2, bsz, hh, ww)   # cheap: out_channels wide
    return iwt_pallas(z, expand=expand)


# --------------------------------------------------------------------------
# Pure-JAX references (mirror the PyTorch module)
# --------------------------------------------------------------------------

def _dwt_ref(x, expand=False):
    x01 = x[:, :, 0::2, :] / 2
    x02 = x[:, :, 1::2, :] / 2
    x1 = x01[:, :, :, 0::2]
    x2 = x02[:, :, :, 0::2]
    x3 = x01[:, :, :, 1::2]
    x4 = x02[:, :, :, 1::2]
    b, c, h, w = x1.shape
    x_LL = x1 + x2 + x3 + x4
    x_HL = -x1 - x2 + x3 + x4
    x_LH = -x1 + x2 - x3 + x4
    x_HH = x1 - x2 - x3 + x4
    if expand:
        res = jnp.zeros((b, c, h * 2, w * 2), dtype=x.dtype)
        res = res.at[:, :, :h, :w].set(x_LL)
        res = res.at[:, :, h:, :w].set(x_HL)
        res = res.at[:, :, :h, w:].set(x_LH)
        res = res.at[:, :, h:, w:].set(x_HH)
        return res
    return jnp.concatenate((x_LL, x_HL, x_LH, x_HH), axis=0)


def _iwt_ref(x, expand=False):
    ib, ic, ih, iw = x.shape
    if expand:
        H, W = ih // 2, iw // 2
        ob, oc, oh, ow = ib, ic, ih, iw
        x1 = x[:, :, :H, :W]
        x2 = x[:, :, H:, :W]
        x3 = x[:, :, :H, W:]
        x4 = x[:, :, H:, W:]
    else:
        ob, oc, oh, ow = ib // 4, ic, 2 * ih, 2 * iw
        x1 = x[0:ob] / 2
        x2 = x[ob:2 * ob] / 2
        x3 = x[2 * ob:3 * ob] / 2
        x4 = x[3 * ob:4 * ob] / 2
    h = jnp.zeros((ob, oc, oh, ow), dtype=x.dtype)
    h = h.at[:, :, 0::2, 0::2].set(x1 - x2 - x3 + x4)
    h = h.at[:, :, 1::2, 0::2].set(x1 - x2 + x3 - x4)
    h = h.at[:, :, 0::2, 1::2].set(x1 + x2 - x3 - x4)
    h = h.at[:, :, 1::2, 1::2].set(x1 + x2 + x3 + x4)
    return h


def _conv3x3_relu_ref(x, w, b):
    y = lax.conv_general_dilated(
        x, w, window_strides=(1, 1), padding=((1, 1), (1, 1)),
        dimension_numbers=("NCHW", "OIHW", "NCHW"),
        precision=lax.Precision.HIGHEST)
    return jax.nn.relu(y + b[None, :, None, None])


def _srcnn_ref(x, w1, b1, w2, b2, expand=False):
    y = _dwt_ref(x, expand)
    y = _conv3x3_relu_ref(y, w1, b1)
    y = _conv3x3_relu_ref(y, w2, b2)
    return _iwt_ref(y, expand)


# --------------------------------------------------------------------------

if __name__ == "__main__":
    key = jax.random.PRNGKey(0)
    kx, kw1, kb1, kw2, kb2 = jax.random.split(key, 5)

    b, c, h, w = 2, 4, 16, 16
    num_channels, out_channels = c, c
    x = jax.random.normal(kx, (b, c, h, w), dtype=jnp.float32)
    w1 = 0.1 * jax.random.normal(kw1, (64, num_channels, 3, 3), dtype=jnp.float32)
    b1 = 0.1 * jax.random.normal(kb1, (64,), dtype=jnp.float32)
    w2 = 0.1 * jax.random.normal(kw2, (out_channels, 64, 3, 3), dtype=jnp.float32)
    b2 = 0.1 * jax.random.normal(kb2, (out_channels,), dtype=jnp.float32)

    # DWT / IWT sub-module checks (expand=False, the SRCNN default).
    d = jax.block_until_ready(dwt_pallas(x))
    assert d.shape == (4 * b, c, h // 2, w // 2), d.shape
    assert jnp.allclose(d, _dwt_ref(x), atol=1e-5, rtol=1e-5)
    r = jax.block_until_ready(iwt_pallas(d))
    assert r.shape == x.shape, r.shape
    assert jnp.allclose(r, _iwt_ref(d), atol=1e-5, rtol=1e-5)
    assert jnp.allclose(r, x, atol=1e-5, rtol=1e-5)  # Haar perfect reconstruction

    # expand=True paths.
    de = jax.block_until_ready(dwt_pallas(x, expand=True))
    assert de.shape == x.shape, de.shape
    assert jnp.allclose(de, _dwt_ref(x, expand=True), atol=1e-5, rtol=1e-5)
    re = jax.block_until_ready(iwt_pallas(de, expand=True))
    assert jnp.allclose(re, _iwt_ref(de, expand=True), atol=1e-5, rtol=1e-5)

    # Standalone windowed conv kernel check (conv1 geometry).
    c1 = jax.block_until_ready(conv3x3_relu_pallas(d, w1, b1))
    c1_ref = _conv3x3_relu_ref(d, w1, b1)
    assert c1.shape == c1_ref.shape, (c1.shape, c1_ref.shape)
    assert jnp.allclose(c1, c1_ref, atol=1e-4, rtol=1e-4), \
        float(jnp.max(jnp.abs(c1 - c1_ref)))

    # Full SRCNN forward: DWT -> conv1+ReLU -> conv2+ReLU -> IWT.
    out = jax.block_until_ready(srcnn_forward_pallas(x, w1, b1, w2, b2))
    ref = _srcnn_ref(x, w1, b1, w2, b2)
    assert out.shape == (b, out_channels, h, w), out.shape
    assert jnp.allclose(out, ref, atol=1e-4, rtol=1e-4), \
        float(jnp.max(jnp.abs(out - ref)))

    # expand=True forward.
    out_e = jax.block_until_ready(
        srcnn_forward_pallas(x, w1, b1, w2, b2, expand=True))
    ref_e = _srcnn_ref(x, w1, b1, w2, b2, expand=True)
    assert jnp.allclose(out_e, ref_e, atol=1e-4, rtol=1e-4), \
        float(jnp.max(jnp.abs(out_e - ref_e)))

    print("KERNEL_OK")
</pallas_src>

<mosaic_0001>
module attributes {stable_mosaic.version = 11 : i64} {
  func.func @_dwt_kernel(%arg0: i32, %arg1: memref<4x1x512xf32, #tpu.memory_space<vmem>>, %arg2: memref<4x1x512xf32, #tpu.memory_space<vmem>>) attributes {dimension_semantics = [#tpu.dimension_semantics<parallel>], iteration_bounds = array<i64: 1>, scalar_prefetch = 0 : i64, scratch_operands = 0 : i64, tpu.core_type = #tpu.core_type<tc>, window_params = [{transform_indices = @transform_0, window_bounds = array<i64: 4, 1, 512>}, {transform_indices = @transform_1, window_bounds = array<i64: 4, 1, 512>}]} {
    %c0 = arith.constant 0 : index
    %c0_0 = arith.constant 0 : index
    %c0_1 = arith.constant 0 : index
    %0 = vector.load %arg1[%c0, %c0_0, %c0_1] : memref<4x1x512xf32, #tpu.memory_space<vmem>>, vector<1x1x512xf32>
    %1 = vector.shape_cast %0 : vector<1x1x512xf32> to vector<1x512xf32>
    %c1 = arith.constant 1 : index
    %c0_2 = arith.constant 0 : index
    %c0_3 = arith.constant 0 : index
    %2 = vector.load %arg1[%c1, %c0_2, %c0_3] : memref<4x1x512xf32, #tpu.memory_space<vmem>>, vector<1x1x512xf32>
    %3 = vector.shape_cast %2 : vector<1x1x512xf32> to vector<1x512xf32>
    %c2 = arith.constant 2 : index
    %c0_4 = arith.constant 0 : index
    %c0_5 = arith.constant 0 : index
    %4 = vector.load %arg1[%c2, %c0_4, %c0_5] : memref<4x1x512xf32, #tpu.memory_space<vmem>>, vector<1x1x512xf32>
    %5 = vector.shape_cast %4 : vector<1x1x512xf32> to vector<1x512xf32>
    %c3 = arith.constant 3 : index
    %c0_6 = arith.constant 0 : index
    %c0_7 = arith.constant 0 : index
    %6 = vector.load %arg1[%c3, %c0_6, %c0_7] : memref<4x1x512xf32, #tpu.memory_space<vmem>>, vector<1x1x512xf32>
    %7 = vector.shape_cast %6 : vector<1x1x512xf32> to vector<1x512xf32>
    %8 = arith.addf %1, %5 : vector<1x512xf32>
    %9 = arith.addf %3, %7 : vector<1x512xf32>
    %10 = arith.subf %5, %1 : vector<1x512xf32>
    %11 = arith.subf %7, %3 : vector<1x512xf32>
    %12 = arith.addf %8, %9 : vector<1x512xf32>
    %cst = arith.constant 5.000000e-01 : f32
    %13 = vector.broadcast %cst : f32 to vector<1x512xf32>
    %14 = arith.mulf %12, %13 : vector<1x512xf32>
    %c0_8 = arith.constant 0 : index
    %c0_9 = arith.constant 0 : index
    %c0_10 = arith.constant 0 : index
    %15 = vector.load %arg2[%c0_8, %c0_9, %c0_10] : memref<4x1x512xf32, #tpu.memory_space<vmem>>, vector<1x1x512xf32>
    %16 = vector.shape_cast %15 : vector<1x1x512xf32> to vector<1x512xf32>
    %17 = vector.shape_cast %14 : vector<1x512xf32> to vector<1x1x512xf32>
    tpu.vector_store %arg2[%c0_8, %c0_9, %c0_10], %17 {strides = array<i32>} : memref<4x1x512xf32, #tpu.memory_space<vmem>>, vector<1x1x512xf32>,
    %18 = arith.subf %9, %8 : vector<1x512xf32>
    %cst_11 = arith.constant 5.000000e-01 : f32
    %19 = vector.broadcast %cst_11 : f32 to vector<1x512xf32>
    %20 = arith.mulf %18, %19 : vector<1x512xf32>
    %c1_12 = arith.constant 1 : index
    %c0_13 = arith.constant 0 : index
    %c0_14 = arith.constant 0 : index
    %21 = vector.load %arg2[%c1_12, %c0_13, %c0_14] : memref<4x1x512xf32, #tpu.memory_space<vmem>>, vector<1x1x512xf32>
    %22 = vector.shape_cast %21 : vector<1x1x512xf32> to vector<1x512xf32>
    %23 = vector.shape_cast %20 : vector<1x512xf32> to vector<1x1x512xf32>
    tpu.vector_store %arg2[%c1_12, %c0_13, %c0_14], %23 {strides = array<i32>} : memref<4x1x512xf32, #tpu.memory_space<vmem>>, vector<1x1x512xf32>,
    %24 = arith.addf %10, %11 : vector<1x512xf32>
    %cst_15 = arith.constant 5.000000e-01 : f32
    %25 = vector.broadcast %cst_15 : f32 to vector<1x512xf32>
    %26 = arith.mulf %24, %25 : vector<1x512xf32>
    %c2_16 = arith.constant 2 : index
    %c0_17 = arith.constant 0 : index
    %c0_18 = arith.constant 0 : index
    %27 = vector.load %arg2[%c2_16, %c0_17, %c0_18] : memref<4x1x512xf32, #tpu.memory_space<vmem>>, vector<1x1x512xf32>
    %28 = vector.shape_cast %27 : vector<1x1x512xf32> to vector<1x512xf32>
    %29 = vector.shape_cast %26 : vector<1x512xf32> to vector<1x1x512xf32>
    tpu.vector_store %arg2[%c2_16, %c0_17, %c0_18], %29 {strides = array<i32>} : memref<4x1x512xf32, #tpu.memory_space<vmem>>, vector<1x1x512xf32>,
    %30 = arith.subf %11, %10 : vector<1x512xf32>
    %cst_19 = arith.constant 5.000000e-01 : f32
    %31 = vector.broadcast %cst_19 : f32 to vector<1x512xf32>
    %32 = arith.mulf %30, %31 : vector<1x512xf32>
    %c3_20 = arith.constant 3 : index
    %c0_21 = arith.constant 0 : index
    %c0_22 = arith.constant 0 : index
    %33 = vector.load %arg2[%c3_20, %c0_21, %c0_22] : memref<4x1x512xf32, #tpu.memory_space<vmem>>, vector<1x1x512xf32>
    %34 = vector.shape_cast %33 : vector<1x1x512xf32> to vector<1x512xf32>
    %35 = vector.shape_cast %32 : vector<1x512xf32> to vector<1x1x512xf32>
    tpu.vector_store %arg2[%c3_20, %c0_21, %c0_22], %35 {strides = array<i32>} : memref<4x1x512xf32, #tpu.memory_space<vmem>>, vector<1x1x512xf32>,
    return
  }
  func.func @transform_0(%arg0: i32) -> (i32, i32, i32) {
    %c0_i32 = arith.constant 0 : i32
    %c0_i32_0 = arith.constant 0 : i32
    %c0_i32_1 = arith.constant 0 : i32
    return %c0_i32, %arg0, %c0_i32_0 : i32, i32, i32
  }
  func.func @transform_1(%arg0: i32) -> (i32, i32, i32) {
    %c0_i32 = arith.constant 0 : i32
    %c0_i32_0 = arith.constant 0 : i32
    %c0_i32_1 = arith.constant 0 : i32
    return %c0_i32, %arg0, %c0_i32_0 : i32, i32, i32
  }
}

</mosaic_0001>

<bundles_post_ra>
// kernel: tpu_custom_call.1
= control target key start
LH: loop header
LB: loop body
LE: loop exit
PB: predicated region body
PF: predicated region fallthrough
CT: control target
= control target key end

     0   :  { %6 = vsyncpa [#allocation3], 0  ;;  %s166_s0 = inlined_call_operand.hbm [shape: f32[4,1,512], index: 0, kind: input, shape index: {}]   ;;  %s167_s1 = inlined_call_operand.hbm [shape: f32[4,1,512], index: 1, kind: output, shape index: {}]  }
   0x1   :  { %7 = vsyncpa [#allocation4], 0  ;;  %s122_s6 = smov [#allocation2]   ;;  %s74_s10 = scalar_lea.hbm %s166_s0, 256 }
   0x2   :  { %s13_s7 = sshll.u32 %s122_s6, 4  ;;  %p75_p0 = scmp.ne.s32.totalorder %s166_s0, %s74_s10  ;;  %s14_s7 = int_to_ptr.vmem [resolvable:$true] %s13_s7 }
   0x3   :  { %p78_p1 = scmp.lt.u32.totalorder %s74_s10, %s166_s0 }
   0x5   :  { %p80_p2 = pnand %p78_p1, %p75_p0 }
   0x7   :  { %83 = shalt.err (!%p80_p2)
}
   0x8   :  { %s84_s15 = scalar_lea.vmem %s14_s7, 256  ;;  %p89_p4 = scmp.lt.s32.totalorder %s14_s7, %s14_s7 }
   0x9   :  { %p85_p3 = scmp.ne.s32.totalorder %s14_s7, %s84_s15  ;;  %p90_p5 = scmp.lt.s32.totalorder %s84_s15, %s84_s15 }
   0xb   :  { %p91_p6 = por %p90_p5, %p89_p4 }
   0xd   :  { %p92_p7 = pnand %p91_p6, %p85_p3 }
   0xf   :  { %95 = shalt.err (!%p92_p7)
}
  0x10   :  { %s123_s16 = smov 64   ;;  %s124_s17 = smov 4  }
  0x11   :  { %19 = dma.hbm_to_vmem [thread:$0]  %s166_s0, 256, %s14_s7, [#allocation3], %s123_s16, %s123_s16, %s124_s17  }
  0x12   :  { %118 = dma.done.wait [#allocation3], 256  }
  0x13   :  { %119 = vsyncadd [#allocation3], 4294967040  ;;  %v23_v0 = vld [vmem:[#allocation2] sm:$0xf]  ;;  %v25_v1 = vld [vmem:[#allocation2 + $0x4] sm:$0xf]  ;;  %v36_v5 = vlaneseq }
  0x14   :  { %v27_v2 = vld [vmem:[#allocation2 + $0x8] sm:$0xf]  ;;  %v29_v3 = vld [vmem:[#allocation2 + $0xc] sm:$0xf]  ;;  %s125_s20 = smov [#allocation5]  }
  0x15   :  { %v30_v4 = vadd.f32 %v27_v2, %v23_v0  ;;  %v32_v6 = vsub.f32 %v27_v2, %v23_v0  ;;  %v31_v7 = vadd.f32 %v29_v3, %v25_v1  ;;  %v33_v8 = vsub.f32 %v29_v3, %v25_v1  ;;  %s58_s21 = sshll.u32 %s125_s20, 4  ;;  %s59_s21 = int_to_ptr.vmem [resolvable:$true] %s58_s21 }
  0x16   :  { %vm38_vm0 = vcmp.lt.s32.totalorder %v36_v5, 512  ;;  %s96_s0 = scalar_lea.vmem %s59_s21, 256  ;;  %p101_p9 = scmp.lt.s32.totalorder %s59_s21, %s59_s21 }
  0x17   :  { %v34_v9 = vadd.f32 %v31_v7, %v30_v4  ;;  %v41_v10 = vsub.f32 %v31_v7, %v30_v4  ;;  %v45_v11 = vadd.f32 %v33_v8, %v32_v6  ;;  %v49_v12 = vsub.f32 %v33_v8, %v32_v6  ;;  %p97_p8 = scmp.ne.s32.totalorder %s59_s21, %s96_s0  ;;  %p102_p10 = scmp.lt.s32.totalorder %s96_s0, %s96_s0 }
  0x19   :  { %v35_v13 = vmul.f32 0.5, %v34_v9  ;;  %v42_v14 = vmul.f32 0.5, %v41_v10  ;;  %v46_v15 = vmul.f32 0.5, %v45_v11  ;;  %v50_v16 = vmul.f32 0.5, %v49_v12  ;;  %p103_p11 = por %p102_p10, %p101_p9 }
  0x1b   :  { %40 = vst.msk [vmem:[#allocation5] sm:$0xf] %vm38_vm0, %v35_v13  ;;  %44 = vst.msk [vmem:[#allocation5 + $0x4] sm:$0xf] %vm38_vm0, %v42_v14  ;;  %p104_p12 = pnand %p103_p11, %p97_p8 }
  0x1c   :  { %48 = vst.msk [vmem:[#allocation5 + $0x8] sm:$0xf] %vm38_vm0, %v46_v15  ;;  %52 = vst.msk [vmem:[#allocation5 + $0xc] sm:$0xf] %vm38_vm0, %v50_v16 }
  0x1d   :  { %107 = shalt.err (!%p104_p12)
}
  0x1e   :  { %s108_s24 = scalar_lea.hbm %s167_s1, 256 }
  0x1f   :  { %p109_p13 = scmp.ne.s32.totalorder %s167_s1, %s108_s24  ;;  %p112_p0 = scmp.lt.u32.totalorder %s108_s24, %s167_s1 }
  0x21   :  { %p114_p1 = pnand %p112_p0, %p109_p13 }
  0x23   :  { %117 = shalt.err (!%p114_p1)
}
  0x24   :  { %64 = dma.vmem_to_hbm [thread:$0]  %s59_s21, 256, %s167_s1, [#allocation4], %s123_s16, %s123_s16, %s124_s17  }
  0x25   :  { %120 = dma.done.wait [#allocation4], 256  }
  0x26   :  { %121 = vsyncadd [#allocation4], 4294967040 }
  0x27   :  { %68 = vsyncpa [#allocation3], 1 }
  0x28   :  { %69 = vsyncpa [#allocation4], 1 }

</bundles_post_ra>
